<compile_context>
chip_gen: v7x
topology: tpu7x:2x2x1
jax: 0.10.0
libtpu: 0.0.40
codegen_flags: <defaults>
</compile_context>

<pallas_src>
import functools

import jax
import jax.numpy as jnp
from jax import lax
from jax.experimental import pallas as pl
from jax.experimental.pallas import tpu as pltpu

LANE = 128


def _round_up(x, m):
    return ((x + m - 1) // m) * m


def _default_row_tile():
    """Per-generation row-tile cap: 512 on 128 MiB VMEM parts (v5e/v6e),
    256 on 64 MiB parts (v7x)."""
    try:
        vmem = getattr(pltpu.get_tpu_info(), "vmem_capacity_bytes", 64 << 20)
    except Exception:
        vmem = 64 << 20
    return 512 if vmem >= (100 << 20) else 256


# ----------------------------------------------------------------------------
# Pallas kernel: one MultiHeadGAT layer, all heads fused.
# ----------------------------------------------------------------------------
def _gat_heads_kernel(s_ref, t_ref, adj_ref, wh_ref, out_ref,
                      *, slope, heads, f_pad, denom_col):
    s_all = s_ref[...]                 # (Tm, H)  f32  h @ (W a_src), row tile
    t_all = t_ref[...]                 # (H, N)   f32  (W a_dst)^T h^T, lane-major
    edge = adj_ref[...] > 0            # (Tm, N)  bf16 adjacency tile -> edge mask

    neg_big = jnp.float32(-9.0e15)
    slope_f = jnp.float32(slope)
    tm = s_all.shape[0]

    acc = jnp.zeros((tm, f_pad), jnp.float32)
    for hd in range(heads):                                   # static unroll, H small
        e = s_all[:, hd:hd + 1] + t_all[hd:hd + 1, :]         # (Tm, N) broadcast add
        # LeakyReLU + adjacency mask folded into a single select pass.
        e = jnp.where(edge, jnp.maximum(e, slope_f * e), neg_big)
        m = jnp.max(e, axis=1, keepdims=True)
        p = jnp.exp(e - m).astype(jnp.bfloat16)               # (Tm, N) bf16
        wh_h = wh_ref[:, hd * f_pad:(hd + 1) * f_pad]         # (N, F_pad) bf16 static slice
        # FLOP-dominant matmul in bf16 with f32 accumulation; softmax
        # normalization deferred past the dot (EUP reciprocal is ~free).
        h_hat = jnp.dot(p, wh_h, preferred_element_type=jnp.float32)   # (Tm, F_pad)
        if denom_col is not None:
            # Softmax denominator comes out of the MXU via the ones column.
            denom = h_hat[:, denom_col:denom_col + 1]
        else:
            denom = jnp.sum(p.astype(jnp.float32), axis=1, keepdims=True)
        acc = acc + h_hat * pl.reciprocal(denom, approx=True)

    out_ref[...] = jnp.tanh(acc * jnp.float32(1.0 / heads))


def multi_head_gat(h, adj, w_all, a_all, *, slope, row_tile=None):
    """One MultiHeadGAT layer.

    h:     (N, F_in) node (label) features, f32
    adj:   (N, N)    dense adjacency (>0 == edge), f32
    w_all: (H, F_in, F_out) per-head projection (pre-transposed vs torch Linear)
    a_all: (H, 2, F_out)    per-head attention vectors [a_src, a_dst]
    returns (N, F_out) = tanh(mean over heads of per-head GAT outputs)
    """
    n, f_in = h.shape
    heads, _, f_out = w_all.shape
    f_pad = _round_up(f_out, LANE)                 # lane-dense padded per-head width
    denom_col = f_out if f_pad > f_out else None   # spare padding lane for the denom

    if row_tile is None:
        row_tile = _default_row_tile()
    row_tile = max(8, _round_up(int(row_tile), 8))
    if n <= row_tile:
        tm = _round_up(n, 8)
        n_pad = tm
    else:
        tm = row_tile
        n_pad = _round_up(n, tm)
    n_tiles = n_pad // tm
    f32 = jnp.float32

    # --- wrapper-side hoisting of all grid-invariant work (one XLA pass) -----
    # Fused per-head projection Wh, padded per head to F_pad lanes, bf16.
    wh = jnp.einsum("ni,hio->nho", h.astype(f32), w_all.astype(f32))   # (N, H, F_out)
    wh_p = jnp.zeros((n_pad, heads, f_pad), f32)
    wh_p = wh_p.at[:n, :, :f_out].set(wh)
    if denom_col is not None:
        wh_p = wh_p.at[:n, :, denom_col].set(1.0)  # ones column -> MXU softmax denom
    wh_bf = wh_p.reshape(n_pad, heads * f_pad).astype(jnp.bfloat16)

    # Attention-logit pieces (s is row-tiled; t is a tiny lane-major constant).
    wa_src = jnp.einsum("hio,ho->ih", w_all, a_all[:, 0, :])           # (F_in, H)
    wa_dst = jnp.einsum("hio,ho->ih", w_all, a_all[:, 1, :])           # (F_in, H)
    s_p = jnp.zeros((n_pad, heads), f32).at[:n].set(h @ wa_src)
    t_p = jnp.zeros((heads, n_pad), f32).at[:, :n].set((h @ wa_dst).T)

    # Adjacency streamed as bf16; padded rows/cols stay zero (== no edge).
    # TODO(synk): for a static graph, precompute the padded bf16 adjacency once.
    adj_p = jnp.zeros((n_pad, n_pad), jnp.bfloat16).at[:n, :n].set(adj.astype(jnp.bfloat16))

    kernel = functools.partial(_gat_heads_kernel, slope=float(slope),
                               heads=heads, f_pad=f_pad, denom_col=denom_col)

    # Cost of the kernel only (projection is no longer re-done per tile).
    flops = int(heads * (2 * n_pad * n_pad * f_pad + 8 * n_pad * n_pad))
    transcendentals = int(heads * n_pad * n_pad + n_pad * f_pad)
    bytes_accessed = int(2 * n_pad * n_pad                      # adj (bf16)
                         + 2 * n_pad * heads * f_pad            # Wh (bf16, fetched once)
                         + 4 * (n_pad * heads + heads * n_pad)  # s, t
                         + 4 * n_pad * f_pad)                   # out

    out_pad = pl.pallas_call(
        kernel,
        out_shape=jax.ShapeDtypeStruct((n_pad, f_pad), f32),
        grid_spec=pltpu.PrefetchScalarGridSpec(
            num_scalar_prefetch=0,
            grid=(n_tiles,),
            in_specs=[
                pl.BlockSpec((tm, heads), lambda i: (i, 0)),             # s row tile
                pl.BlockSpec((heads, n_pad), lambda i: (0, 0)),          # t (constant)
                pl.BlockSpec((tm, n_pad), lambda i: (i, 0)),             # adj row tile
                pl.BlockSpec((n_pad, heads * f_pad), lambda i: (0, 0)),  # Wh bf16 (constant)
            ],
            out_specs=pl.BlockSpec((tm, f_pad), lambda i: (i, 0)),       # lane-dense out
        ),
        compiler_params=pltpu.CompilerParams(
            dimension_semantics=("parallel",),          # row tiles independent
            vmem_limit_bytes=48 * 1024 * 1024),         # safe on 64 MiB v7x VMEM
        cost_estimate=pl.CostEstimate(flops=flops,
                                      transcendentals=transcendentals,
                                      bytes_accessed=bytes_accessed),
    )(s_p, t_p, adj_p, wh_bf)

    return out_pad[:n, :f_out]


# ----------------------------------------------------------------------------
# Pure-JAX reference for the GAT layer (matches the PyTorch module semantics).
# ----------------------------------------------------------------------------
def _multi_head_gat_ref(h, adj, w_all, a_all, *, slope):
    heads = w_all.shape[0]
    outs = []
    for k in range(heads):
        wh = h @ w_all[k]
        s = wh @ a_all[k, 0]
        t = wh @ a_all[k, 1]
        e = s[:, None] + t[None, :]
        e = jnp.where(e > 0, e, slope * e)
        e = jnp.where(adj > 0, e, -9.0e15)
        att = jax.nn.softmax(e, axis=1)
        outs.append(att @ wh)
    return jnp.tanh(jnp.stack(outs, axis=0).mean(0))


# ----------------------------------------------------------------------------
# Rest of MAGNET (plain JAX): embedding lookup, BiLSTM, final projection.
# ----------------------------------------------------------------------------
def _lstm_direction(x, w_ih, w_hh, b_ih, b_hh, reverse):
    b, _, _ = x.shape
    hdim = w_hh.shape[1]
    xs = jnp.swapaxes(x, 0, 1)                 # (T, B, F)
    if reverse:
        xs = xs[::-1]

    def step(carry, x_t):
        h, c = carry
        gates = x_t @ w_ih.T + h @ w_hh.T + b_ih + b_hh
        i, f, g, o = jnp.split(gates, 4, axis=-1)
        i = jax.nn.sigmoid(i)
        f = jax.nn.sigmoid(f)
        g = jnp.tanh(g)
        o = jax.nn.sigmoid(o)
        c = f * c + i * g
        h = o * jnp.tanh(c)
        return (h, c), None

    init = (jnp.zeros((b, hdim), x.dtype), jnp.zeros((b, hdim), x.dtype))
    (h, _), _ = lax.scan(step, init, xs)
    return h                                   # final hidden of this direction


def magnet_forward(params, token, label_embedding, *, slope, use_pallas=True):
    feats = jnp.take(params["embeddings"], token, axis=0)            # (B, T, input)
    h_f = _lstm_direction(feats, *params["lstm_fwd"], reverse=False)  # (B, H)
    h_b = _lstm_direction(feats, *params["lstm_bwd"], reverse=True)   # (B, H)
    seq_feat = jnp.concatenate([h_f, h_b], axis=1)                    # (B, 2H)
    # TODO(synk): dropout is eval-mode identity here (training-mode RNG mask omitted).
    gat_fn = multi_head_gat if use_pallas else _multi_head_gat_ref
    x = gat_fn(label_embedding, params["adjacency"],
               params["gat1_w"], params["gat1_a"], slope=slope)
    x = gat_fn(x, params["adjacency"],
               params["gat2_w"], params["gat2_a"], slope=slope)       # (labels, 2H)
    att = x.T                                                         # (2H, labels)
    return seq_feat @ att                                             # (B, labels)


# ----------------------------------------------------------------------------
# Deterministic small-scale test.
# ----------------------------------------------------------------------------
if __name__ == "__main__":
    VOCAB, INPUT, HIDDEN, LABELS, HEADS, SLOPE = 32, 16, 32, 16, 4, 0.01
    B, T = 2, 8
    OUT = 2 * HIDDEN

    key = jax.random.PRNGKey(0)
    keys = jax.random.split(key, 16)

    def u(k, shape, s):
        return jax.random.uniform(k, shape, jnp.float32, -s, s)

    token = jax.random.randint(keys[0], (B, T), 0, VOCAB)
    label_embedding = jax.random.normal(keys[1], (LABELS, INPUT), jnp.float32)

    adj_rand = jax.random.uniform(keys[2], (LABELS, LABELS))
    adjacency = (adj_rand + adj_rand.T > 1.0).astype(jnp.float32)
    adjacency = jnp.maximum(adjacency, jnp.eye(LABELS, dtype=jnp.float32))

    embeddings = jax.random.normal(keys[3], (VOCAB, INPUT), jnp.float32) * 0.5

    sh = 1.0 / float(HIDDEN) ** 0.5
    lstm_fwd = (u(keys[4], (4 * HIDDEN, INPUT), sh), u(keys[5], (4 * HIDDEN, HIDDEN), sh),
                u(keys[6], (4 * HIDDEN,), sh), u(keys[7], (4 * HIDDEN,), sh))
    lstm_bwd = (u(keys[8], (4 * HIDDEN, INPUT), sh), u(keys[9], (4 * HIDDEN, HIDDEN), sh),
                u(keys[10], (4 * HIDDEN,), sh), u(keys[11], (4 * HIDDEN,), sh))

    bw1 = 1.0 / float(INPUT) ** 0.5
    ba = 1.0 / float(2 * OUT) ** 0.5
    bw2 = 1.0 / float(OUT) ** 0.5
    gat1_w = u(keys[12], (HEADS, INPUT, OUT), bw1)
    gat1_a = u(keys[13], (HEADS, 2, OUT), ba)
    gat2_w = u(keys[14], (HEADS, OUT, OUT), bw2)
    gat2_a = u(keys[15], (HEADS, 2, OUT), ba)

    params = dict(embeddings=embeddings, lstm_fwd=lstm_fwd, lstm_bwd=lstm_bwd,
                  adjacency=adjacency, gat1_w=gat1_w, gat1_a=gat1_a,
                  gat2_w=gat2_w, gat2_a=gat2_a)

    # --- GAT layer: Pallas vs pure-JAX reference (single-tile and row-tiled) ---
    gat1_ref = _multi_head_gat_ref(label_embedding, adjacency, gat1_w, gat1_a, slope=SLOPE)

    gat1_pallas = jax.block_until_ready(
        multi_head_gat(label_embedding, adjacency, gat1_w, gat1_a, slope=SLOPE))
    assert gat1_pallas.shape == (LABELS, OUT)
    assert jnp.allclose(gat1_pallas, gat1_ref, atol=3e-2, rtol=3e-2), "GAT layer mismatch"

    gat1_tiled = jax.block_until_ready(
        multi_head_gat(label_embedding, adjacency, gat1_w, gat1_a, slope=SLOPE, row_tile=8))
    assert jnp.allclose(gat1_tiled, gat1_ref, atol=3e-2, rtol=3e-2), "row-tiled GAT mismatch"

    # --- padding path: N not a multiple of 8 -> wrapper zero-pads nodes --------
    h10 = label_embedding[:10]
    adj10 = jnp.maximum(adjacency[:10, :10], jnp.eye(10, dtype=jnp.float32))
    gat10_ref = _multi_head_gat_ref(h10, adj10, gat1_w, gat1_a, slope=SLOPE)
    gat10_pallas = jax.block_until_ready(
        multi_head_gat(h10, adj10, gat1_w, gat1_a, slope=SLOPE))
    assert gat10_pallas.shape == (10, OUT)
    assert jnp.allclose(gat10_pallas, gat10_ref, atol=3e-2, rtol=3e-2), "padded GAT mismatch"

    # --- Full MAGNET forward: Pallas GAT vs reference GAT -----------------------
    out = jax.block_until_ready(
        magnet_forward(params, token, label_embedding, slope=SLOPE, use_pallas=True))
    ref = magnet_forward(params, token, label_embedding, slope=SLOPE, use_pallas=False)
    assert out.shape == (B, LABELS)
    assert jnp.allclose(out, ref, atol=5e-2, rtol=5e-2), "MAGNET forward mismatch"

    print("KERNEL_OK")
</pallas_src>

<mosaic_0001>
module attributes {stable_mosaic.version = 11 : i64} {
  func.func @_gat_heads_kernel(%arg0: i32, %arg1: memref<16x4xf32, #tpu.memory_space<vmem>>, %arg2: memref<4x16xf32, #tpu.memory_space<vmem>>, %arg3: memref<16x16xbf16, #tpu.memory_space<vmem>>, %arg4: memref<16x512xbf16, #tpu.memory_space<vmem>>, %arg5: memref<16x128xf32, #tpu.memory_space<vmem>>) attributes {dimension_semantics = [#tpu.dimension_semantics<parallel>], iteration_bounds = array<i64: 1>, scalar_prefetch = 0 : i64, scratch_operands = 0 : i64, tpu.core_type = #tpu.core_type<tc>, window_params = [{transform_indices = @transform_0, window_bounds = array<i64: 16, 4>}, {pipeline_mode = #tpu.pipeline_mode<synchronous>, transform_indices = @transform_1, window_bounds = array<i64: 4, 16>}, {transform_indices = @transform_2, window_bounds = array<i64: 16, 16>}, {pipeline_mode = #tpu.pipeline_mode<synchronous>, transform_indices = @transform_3, window_bounds = array<i64: 16, 512>}, {transform_indices = @transform_4, window_bounds = array<i64: 16, 128>}]} {
    %c0 = arith.constant 0 : index
    %c0_0 = arith.constant 0 : index
    %0 = vector.load %arg1[%c0, %c0_0] : memref<16x4xf32, #tpu.memory_space<vmem>>, vector<16x4xf32>
    %c0_1 = arith.constant 0 : index
    %c0_2 = arith.constant 0 : index
    %1 = vector.load %arg2[%c0_1, %c0_2] : memref<4x16xf32, #tpu.memory_space<vmem>>, vector<4x16xf32>
    %c0_3 = arith.constant 0 : index
    %c0_4 = arith.constant 0 : index
    %2 = vector.load %arg3[%c0_3, %c0_4] : memref<16x16xbf16, #tpu.memory_space<vmem>>, vector<16x16xbf16>
    %cst = arith.constant 0.000000e+00 : bf16
    %3 = vector.broadcast %cst : bf16 to vector<16x16xbf16>
    %4 = arith.cmpf ogt, %2, %3 : vector<16x16xbf16>
    %cst_5 = arith.constant 0.000000e+00 : f32
    %5 = vector.broadcast %cst_5 : f32 to vector<16x128xf32>
    %6 = vector.extract_strided_slice %0 {offsets = [0, 0], sizes = [16, 1], strides = [1, 1]} : vector<16x4xf32> to vector<16x1xf32>
    %7 = vector.extract_strided_slice %1 {offsets = [0, 0], sizes = [1, 16], strides = [1, 1]} : vector<4x16xf32> to vector<1x16xf32>
    %8 = vector.broadcast %6 : vector<16x1xf32> to vector<16x16xf32>
    %9 = vector.broadcast %7 : vector<1x16xf32> to vector<16x16xf32>
    %10 = arith.addf %8, %9 : vector<16x16xf32>
    %cst_6 = arith.constant 0.00999999977 : f32
    %11 = vector.broadcast %cst_6 : f32 to vector<16x16xf32>
    %12 = arith.mulf %11, %10 : vector<16x16xf32>
    %13 = arith.maximumf %10, %12 : vector<16x16xf32>
    %cst_7 = arith.constant -9.000000e+15 : f32
    %14 = vector.broadcast %cst_7 : f32 to vector<16x16xf32>
    %15 = arith.select %4, %13, %14 : vector<16x16xi1>, vector<16x16xf32>
    %cst_8 = arith.constant dense<0xFF800000> : vector<16xf32>
    %16 = vector.multi_reduction <maximumf>, %15, %cst_8 [1] : vector<16x16xf32> to vector<16xf32>
    %17 = vector.shape_cast %16 : vector<16xf32> to vector<16x1xf32>
    %18 = vector.broadcast %17 : vector<16x1xf32> to vector<16x16xf32>
    %19 = arith.subf %15, %18 : vector<16x16xf32>
    %20 = math.exp %19 : vector<16x16xf32>
    %21 = arith.truncf %20 : vector<16x16xf32> to vector<16x16xbf16>
    %c0_9 = arith.constant 0 : index
    %c0_10 = arith.constant 0 : index
    %22 = vector.load %arg4[%c0_9, %c0_10] : memref<16x512xbf16, #tpu.memory_space<vmem>>, vector<16x128xbf16>
    %cst_11 = arith.constant dense<0.000000e+00> : vector<16x128xf32>
    %23 = tpu.matmul %21, %22, %cst_11 {dimension_numbers = #tpu.dot_dimension_numbers<[1], [0], [0], [1], [0, 0, 1, 1], [], []>} : vector<16x16xbf16>, vector<16x128xbf16>, vector<16x128xf32> -> vector<16x128xf32>
    %24 = vector.extract_strided_slice %23 {offsets = [0, 64], sizes = [16, 1], strides = [1, 1]} : vector<16x128xf32> to vector<16x1xf32>
    %25 = tpu.reciprocal %24 {approx = true} : vector<16x1xf32> -> vector<16x1xf32>
    %26 = vector.broadcast %25 : vector<16x1xf32> to vector<16x128xf32>
    %27 = arith.mulf %23, %26 : vector<16x128xf32>
    %28 = arith.addf %5, %27 : vector<16x128xf32>
    %29 = vector.extract_strided_slice %0 {offsets = [0, 1], sizes = [16, 1], strides = [1, 1]} : vector<16x4xf32> to vector<16x1xf32>
    %30 = vector.extract_strided_slice %1 {offsets = [1, 0], sizes = [1, 16], strides = [1, 1]} : vector<4x16xf32> to vector<1x16xf32>
    %31 = vector.broadcast %29 : vector<16x1xf32> to vector<16x16xf32>
    %32 = vector.broadcast %30 : vector<1x16xf32> to vector<16x16xf32>
    %33 = arith.addf %31, %32 : vector<16x16xf32>
    %cst_12 = arith.constant 0.00999999977 : f32
    %34 = vector.broadcast %cst_12 : f32 to vector<16x16xf32>
    %35 = arith.mulf %34, %33 : vector<16x16xf32>
    %36 = arith.maximumf %33, %35 : vector<16x16xf32>
    %cst_13 = arith.constant -9.000000e+15 : f32
    %37 = vector.broadcast %cst_13 : f32 to vector<16x16xf32>
    %38 = arith.select %4, %36, %37 : vector<16x16xi1>, vector<16x16xf32>
    %cst_14 = arith.constant dense<0xFF800000> : vector<16xf32>
    %39 = vector.multi_reduction <maximumf>, %38, %cst_14 [1] : vector<16x16xf32> to vector<16xf32>
    %40 = vector.shape_cast %39 : vector<16xf32> to vector<16x1xf32>
    %41 = vector.broadcast %40 : vector<16x1xf32> to vector<16x16xf32>
    %42 = arith.subf %38, %41 : vector<16x16xf32>
    %43 = math.exp %42 : vector<16x16xf32>
    %44 = arith.truncf %43 : vector<16x16xf32> to vector<16x16xbf16>
    %c0_15 = arith.constant 0 : index
    %c128 = arith.constant 128 : index
    %45 = vector.load %arg4[%c0_15, %c128] : memref<16x512xbf16, #tpu.memory_space<vmem>>, vector<16x128xbf16>
    %cst_16 = arith.constant dense<0.000000e+00> : vector<16x128xf32>
    %46 = tpu.matmul %44, %45, %cst_16 {dimension_numbers = #tpu.dot_dimension_numbers<[1], [0], [0], [1], [0, 0, 1, 1], [], []>} : vector<16x16xbf16>, vector<16x128xbf16>, vector<16x128xf32> -> vector<16x128xf32>
    %47 = vector.extract_strided_slice %46 {offsets = [0, 64], sizes = [16, 1], strides = [1, 1]} : vector<16x128xf32> to vector<16x1xf32>
    %48 = tpu.reciprocal %47 {approx = true} : vector<16x1xf32> -> vector<16x1xf32>
    %49 = vector.broadcast %48 : vector<16x1xf32> to vector<16x128xf32>
    %50 = arith.mulf %46, %49 : vector<16x128xf32>
    %51 = arith.addf %28, %50 : vector<16x128xf32>
    %52 = vector.extract_strided_slice %0 {offsets = [0, 2], sizes = [16, 1], strides = [1, 1]} : vector<16x4xf32> to vector<16x1xf32>
    %53 = vector.extract_strided_slice %1 {offsets = [2, 0], sizes = [1, 16], strides = [1, 1]} : vector<4x16xf32> to vector<1x16xf32>
    %54 = vector.broadcast %52 : vector<16x1xf32> to vector<16x16xf32>
    %55 = vector.broadcast %53 : vector<1x16xf32> to vector<16x16xf32>
    %56 = arith.addf %54, %55 : vector<16x16xf32>
    %cst_17 = arith.constant 0.00999999977 : f32
    %57 = vector.broadcast %cst_17 : f32 to vector<16x16xf32>
    %58 = arith.mulf %57, %56 : vector<16x16xf32>
    %59 = arith.maximumf %56, %58 : vector<16x16xf32>
    %cst_18 = arith.constant -9.000000e+15 : f32
    %60 = vector.broadcast %cst_18 : f32 to vector<16x16xf32>
    %61 = arith.select %4, %59, %60 : vector<16x16xi1>, vector<16x16xf32>
    %cst_19 = arith.constant dense<0xFF800000> : vector<16xf32>
    %62 = vector.multi_reduction <maximumf>, %61, %cst_19 [1] : vector<16x16xf32> to vector<16xf32>
    %63 = vector.shape_cast %62 : vector<16xf32> to vector<16x1xf32>
    %64 = vector.broadcast %63 : vector<16x1xf32> to vector<16x16xf32>
    %65 = arith.subf %61, %64 : vector<16x16xf32>
    %66 = math.exp %65 : vector<16x16xf32>
    %67 = arith.truncf %66 : vector<16x16xf32> to vector<16x16xbf16>
    %c0_20 = arith.constant 0 : index
    %c256 = arith.constant 256 : index
    %68 = vector.load %arg4[%c0_20, %c256] : memref<16x512xbf16, #tpu.memory_space<vmem>>, vector<16x128xbf16>
    %cst_21 = arith.constant dense<0.000000e+00> : vector<16x128xf32>
    %69 = tpu.matmul %67, %68, %cst_21 {dimension_numbers = #tpu.dot_dimension_numbers<[1], [0], [0], [1], [0, 0, 1, 1], [], []>} : vector<16x16xbf16>, vector<16x128xbf16>, vector<16x128xf32> -> vector<16x128xf32>
    %70 = vector.extract_strided_slice %69 {offsets = [0, 64], sizes = [16, 1], strides = [1, 1]} : vector<16x128xf32> to vector<16x1xf32>
    %71 = tpu.reciprocal %70 {approx = true} : vector<16x1xf32> -> vector<16x1xf32>
    %72 = vector.broadcast %71 : vector<16x1xf32> to vector<16x128xf32>
    %73 = arith.mulf %69, %72 : vector<16x128xf32>
    %74 = arith.addf %51, %73 : vector<16x128xf32>
    %75 = vector.extract_strided_slice %0 {offsets = [0, 3], sizes = [16, 1], strides = [1, 1]} : vector<16x4xf32> to vector<16x1xf32>
    %76 = vector.extract_strided_slice %1 {offsets = [3, 0], sizes = [1, 16], strides = [1, 1]} : vector<4x16xf32> to vector<1x16xf32>
    %77 = vector.broadcast %75 : vector<16x1xf32> to vector<16x16xf32>
    %78 = vector.broadcast %76 : vector<1x16xf32> to vector<16x16xf32>
    %79 = arith.addf %77, %78 : vector<16x16xf32>
    %cst_22 = arith.constant 0.00999999977 : f32
    %80 = vector.broadcast %cst_22 : f32 to vector<16x16xf32>
    %81 = arith.mulf %80, %79 : vector<16x16xf32>
    %82 = arith.maximumf %79, %81 : vector<16x16xf32>
    %cst_23 = arith.constant -9.000000e+15 : f32
    %83 = vector.broadcast %cst_23 : f32 to vector<16x16xf32>
    %84 = arith.select %4, %82, %83 : vector<16x16xi1>, vector<16x16xf32>
    %cst_24 = arith.constant dense<0xFF800000> : vector<16xf32>
    %85 = vector.multi_reduction <maximumf>, %84, %cst_24 [1] : vector<16x16xf32> to vector<16xf32>
    %86 = vector.shape_cast %85 : vector<16xf32> to vector<16x1xf32>
    %87 = vector.broadcast %86 : vector<16x1xf32> to vector<16x16xf32>
    %88 = arith.subf %84, %87 : vector<16x16xf32>
    %89 = math.exp %88 : vector<16x16xf32>
    %90 = arith.truncf %89 : vector<16x16xf32> to vector<16x16xbf16>
    %c0_25 = arith.constant 0 : index
    %c384 = arith.constant 384 : index
    %91 = vector.load %arg4[%c0_25, %c384] : memref<16x512xbf16, #tpu.memory_space<vmem>>, vector<16x128xbf16>
    %cst_26 = arith.constant dense<0.000000e+00> : vector<16x128xf32>
    %92 = tpu.matmul %90, %91, %cst_26 {dimension_numbers = #tpu.dot_dimension_numbers<[1], [0], [0], [1], [0, 0, 1, 1], [], []>} : vector<16x16xbf16>, vector<16x128xbf16>, vector<16x128xf32> -> vector<16x128xf32>
    %93 = vector.extract_strided_slice %92 {offsets = [0, 64], sizes = [16, 1], strides = [1, 1]} : vector<16x128xf32> to vector<16x1xf32>
    %94 = tpu.reciprocal %93 {approx = true} : vector<16x1xf32> -> vector<16x1xf32>
    %95 = vector.broadcast %94 : vector<16x1xf32> to vector<16x128xf32>
    %96 = arith.mulf %92, %95 : vector<16x128xf32>
    %97 = arith.addf %74, %96 : vector<16x128xf32>
    %cst_27 = arith.constant 2.500000e-01 : f32
    %98 = vector.broadcast %cst_27 : f32 to vector<16x128xf32>
    %99 = arith.mulf %97, %98 : vector<16x128xf32>
    %100 = math.tanh %99 : vector<16x128xf32>
    %c0_28 = arith.constant 0 : index
    %c0_29 = arith.constant 0 : index
    %101 = vector.load %arg5[%c0_28, %c0_29] : memref<16x128xf32, #tpu.memory_space<vmem>>, vector<16x128xf32>
    tpu.vector_store %arg5[%c0_28, %c0_29], %100 {strides = array<i32>} : memref<16x128xf32, #tpu.memory_space<vmem>>, vector<16x128xf32>,
    return
  }
  func.func @transform_0(%arg0: i32) -> (i32, i32) {
    %c0_i32 = arith.constant 0 : i32
    %c0_i32_0 = arith.constant 0 : i32
    return %arg0, %c0_i32 : i32, i32
  }
  func.func @transform_1(%arg0: i32) -> (i32, i32) {
    %c0_i32 = arith.constant 0 : i32
    %c0_i32_0 = arith.constant 0 : i32
    %c0_i32_1 = arith.constant 0 : i32
    return %c0_i32, %c0_i32_0 : i32, i32
  }
  func.func @transform_2(%arg0: i32) -> (i32, i32) {
    %c0_i32 = arith.constant 0 : i32
    %c0_i32_0 = arith.constant 0 : i32
    return %arg0, %c0_i32 : i32, i32
  }
  func.func @transform_3(%arg0: i32) -> (i32, i32) {
    %c0_i32 = arith.constant 0 : i32
    %c0_i32_0 = arith.constant 0 : i32
    %c0_i32_1 = arith.constant 0 : i32
    return %c0_i32, %c0_i32_0 : i32, i32
  }
  func.func @transform_4(%arg0: i32) -> (i32, i32) {
    %c0_i32 = arith.constant 0 : i32
    %c0_i32_0 = arith.constant 0 : i32
    return %arg0, %c0_i32 : i32, i32
  }
}

</mosaic_0001>

<bundles_post_ra>
// kernel: tpu_custom_call.1
= control target key start
LH: loop header
LB: loop body
LE: loop exit
PB: predicated region body
PF: predicated region fallthrough
CT: control target
= control target key end

     0   :  { %9 = vsyncpa [#allocation3], 0  ;;  %s744_s0 = inlined_call_operand.vmem [shape: f32[16,4], index: 0, kind: input, shape index: {}]   ;;  %s745_s1 = inlined_call_operand.vmem [shape: f32[4,16], index: 1, kind: input, shape index: {}]   ;;  %s746_s2 = inlined_call_operand.vmem [shape: bf16[16,16], index: 2, kind: input, shape index: {}]   ;;  %s747_s3 = inlined_call_operand.hbm [shape: bf16[16,512], index: 3, kind: input, shape index: {}]   ;;  %s748_s4 = inlined_call_operand.hbm [shape: f32[16,128], index: 4, kind: output, shape index: {}]  }
   0x1   :  { %10 = vsyncpa [#allocation4], 0  ;;  %s627_s15 = smov [#allocation2]   ;;  %s579_s19 = scalar_lea.hbm %s747_s3, 512 }
   0x2   :  { %s22_s16 = sshll.u32 %s627_s15, 4  ;;  %p580_p0 = scmp.ne.s32.totalorder %s747_s3, %s579_s19  ;;  %s23_s16 = int_to_ptr.vmem [resolvable:$true] %s22_s16 }
   0x3   :  { %p583_p1 = scmp.lt.u32.totalorder %s579_s19, %s747_s3 }
   0x5   :  { %p585_p2 = pnand %p583_p1, %p580_p0 }
   0x7   :  { %588 = shalt.err (!%p585_p2)
}
   0x8   :  { %s589_s24 = scalar_lea.vmem %s23_s16, 512  ;;  %p594_p4 = scmp.lt.s32.totalorder %s23_s16, %s23_s16 }
   0x9   :  { %p590_p3 = scmp.ne.s32.totalorder %s23_s16, %s589_s24  ;;  %p595_p5 = scmp.lt.s32.totalorder %s589_s24, %s589_s24 }
   0xb   :  { %p596_p6 = por %p595_p5, %p594_p4 }
   0xd   :  { %p597_p7 = pnand %p596_p6, %p590_p3 }
   0xf   :  { %600 = shalt.err (!%p597_p7)
}
  0x10   :  { %s628_s25 = smov 256   ;;  %s629_s26 = smov 16  }
  0x11   :  { %28 = dma.hbm_to_vmem [thread:$0]  %s747_s3, 512, %s23_s16, [#allocation3], %s628_s25, %s628_s25, %s629_s26  }
  0x12   :  { %623 = dma.done.wait [#allocation3], 512  }
  0x13   :  { %624 = vsyncadd [#allocation3], 4294966784  ;;  %v630_v0 = vmov 1   ;;  %v631_v1 = vmov 0   ;;  %v35_v2 = vld [vmem:[%s744_s0] sm:$0xff]  ;;  %v36_v3 = vld [vmem:[%s744_s0 + $0x8] sm:$0xff]  ;;  %v52_v6 = vlaneseq }
  0x14   :  { %532 = vset.pattern.permute.xlu1 %v630_v0  ;;  %531 = vset.pattern.permute.xlu0 %v631_v1  ;;  %v632_v4 = vmov 2   ;;  %v633_v5 = vmov 3   ;;  %v38_v8 = vld [vmem:[%s746_s2] sm:$0xf]  ;;  %v39_v12 = vld [vmem:[%s746_s2 + $0x4] sm:$0xf] }
  0x15   :  { %153 = vperm.xlu1 %532, %v35_v2   ;;  %44 = vperm.xlu0 %531, %v35_v2   ;;  %v53_v7 = vshrl.u32 %v52_v6, 7  ;;  %vm40_vm0 = vcmp.gt.bf16.partialorder %v38_v8, 0  ;;  %v37_v11 = vld [vmem:[%s745_s1] sm:$0xf]  ;;  %vm41_vm1 = vcmp.gt.bf16.partialorder %v39_v12, 0  ;;  %vm70_vm3 = vcmask 130048  }
  0x16   :  { %v62_v13 = vsel %vm40_vm0, 65537, %v631_v1  ;;  %v63_v19 = vsel %vm41_vm1, 65537, %v631_v1  ;;  %vm635_vm5 = vmmov 0   ;;  %v541_v38 = vld [vmem:[#allocation2 + $0x8] ss:$16 sps:$4 sm:$0xff]   ;;  %s637_s1 = smov [#allocation5]  }
  0x17   :  { %v162_v9 = vsub.s32 1, %v53_v7  ;;  %v54_v10 = vsub.s32 0, %v53_v7  ;;  %v64_v16 = vunpack.c.l.b16 %v62_v13  ;;  %v263_v22 = vsub.s32 2, %v53_v7  ;;  %s466_s2 = sshll.u32 %s637_s1, 4  ;;  %s467_s2 = int_to_ptr.vmem [resolvable:$true] %s466_s2 }
  0x18   :  { %v65_v25 = vunpack.c.l.b16 %v63_v19  ;;  %v364_v34 = vsub.s32 3, %v53_v7  ;;  %s601_s11 = scalar_lea.vmem %s467_s2, 256  ;;  %p606_p9 = scmp.lt.s32.totalorder %s467_s2, %s467_s2 }
  0x19   :  { %157 = vperm.xlu1 %532, %v36_v3   ;;  %49 = vperm.xlu0 %531, %v36_v3   ;;  %v163_v14 = vrot.slane %v37_v11, %v162_v9  ;;  %v55_v15 = vrot.slane %v37_v11, %v54_v10  ;;  %vm692_vm2 = vcmp.ne.s32.totalorder %v64_v16, 0  ;;  %v264_v33 = vrot.slane %v37_v11, %v263_v22  ;;  %v539_v9 = vld [vmem:[#allocation2] ss:$16 sps:$4 sm:$0xff]   ;;  %p602_p8 = scmp.ne.s32.totalorder %s467_s2, %s601_s11  ;;  %p607_p10 = scmp.lt.s32.totalorder %s601_s11, %s601_s11 }
  0x1a   :  { %vm698_vm4 = vcmp.ne.s32.totalorder %v65_v25, 0  ;;  %v365_v48 = vrot.slane %v37_v11, %v364_v34  ;;  %v634_v10 = vmov 0.0   ;;  %v540_v11 = vld [vmem:[#allocation2 + $0x4] ss:$16 sps:$4 sm:$0xff]  }
  0x1b   :  { %494 = vmatprep.subr.bf16.mxu0 %v634_v10  ;;  %500 = vmatprep.subr.bf16.mxu1 %v634_v10  ;;  %p608_p11 = por %p607_p10, %p606_p9 }
  0x1c   :  { %495 = vmatpush3.bf16.msra.mxu0 %v539_v9  ;;  %496 = vmatprep.mubr.msk.bf16.mxu0 %vm635_vm5, %v634_v10 }
  0x1d   :  { %534 = vset.pattern.permute.xlu1 %v632_v4  ;;  %533 = vset.pattern.permute.xlu0 %v632_v4  ;;  %p609_p12 = pnand %p608_p11, %p602_p8 }
  0x1e   :  { %258 = vperm.xlu1 %534, %v36_v3   ;;  %254 = vperm.xlu0 %533, %v35_v2  }
  0x1f   :  { %506 = vmatprep.subr.bf16.mxu0 %v634_v10  ;;  %502 = vmatprep.mubr.msk.bf16.mxu1 %vm635_vm5, %v634_v10 }
  0x20   :  { %501 = vmatpush3.bf16.msra.mxu1 %v540_v11 }
  0x21   :  { %512 = vmatprep.subr.bf16.mxu1 %v634_v10 }
  0x22   :  { %535 = vset.pattern.permute.xlu1 %v633_v5  ;;  %536 = vset.pattern.permute.xlu0 %v633_v5 }
  0x23   :  { %355 = vperm.xlu1 %535, %v35_v2   ;;  %359 = vperm.xlu0 %536, %v36_v3  }
  0x94   :  { %v154_v17 = vpop.permute.xlu1 %153  ;;  %v45_v18 = vpop.permute.xlu0 %44 }
  0x95   :  { %v164_v20 = vadd.f32 %v163_v14, %v154_v17  ;;  %v56_v21 = vadd.f32 %v55_v15, %v45_v18 }
  0x97   :  { %v166_v23 = vmul.f32 0.01, %v164_v20  ;;  %v58_v24 = vmul.f32 0.01, %v56_v21 }
  0x98   :  { %v158_v27 = vpop.permute.xlu1 %157  ;;  %v50_v28 = vpop.permute.xlu0 %49 }
  0x99   :  { %v168_v29 = vmax.f32 %v164_v20, %v166_v23  ;;  %v60_v30 = vmax.f32 %v56_v21, %v58_v24  ;;  %v165_v31 = vadd.f32 %v163_v14, %v158_v27  ;;  %v57_v32 = vadd.f32 %v55_v15, %v50_v28 }
  0x9b   :  { %v167_v35 = vmul.f32 0.01, %v165_v31  ;;  %v59_v36 = vmul.f32 0.01, %v57_v32  ;;  %v68_v37 = vsel %vm692_vm2, %v60_v30, -9e+15 }
  0x9c   :  { %v71_v39 = vsel %vm70_vm3, %v68_v37, -inf  ;;  %v170_v44 = vsel %vm692_vm2, %v168_v29, -9e+15 }
  0x9d   :  { %v169_v40 = vmax.f32 %v165_v31, %v167_v35  ;;  %v61_v41 = vmax.f32 %v57_v32, %v59_v36  ;;  %72 = vmax.xlane.f32.xlu1 %v71_v39  ;;  %v255_v42 = vpop.permute.xlu0 %254  ;;  %v259_v43 = vpop.permute.xlu1 %258  ;;  %v172_v51 = vsel %vm70_vm3, %v170_v44, -inf }
  0x9e   :  { %v265_v45 = vadd.f32 %v264_v33, %v255_v42  ;;  %v266_v46 = vadd.f32 %v264_v33, %v259_v43  ;;  %v542_v42 = vld [vmem:[#allocation2 + $0xc] ss:$16 sps:$4 sm:$0xff]  }
  0x9f   :  { %v69_v47 = vsel %vm698_vm4, %v61_v41, -9e+15  ;;  %v171_v53 = vsel %vm698_vm4, %v169_v40, -9e+15 }
  0xa0   :  { %v267_v49 = vmul.f32 0.01, %v265_v45  ;;  %v268_v50 = vmul.f32 0.01, %v266_v46  ;;  %v74_v52 = vsel %vm70_vm3, %v69_v47, -inf  ;;  %v175_v60 = vsel %vm70_vm3, %v171_v53, -inf }
  0xa1   :  { %173 = vmax.xlane.f32.xlu1 %v172_v51  ;;  %75 = vmax.xlane.f32.xlu0 %v74_v52 }
  0xa2   :  { %v269_v54 = vmax.f32 %v265_v45, %v267_v49  ;;  %v270_v55 = vmax.f32 %v266_v46, %v268_v50  ;;  %v356_v56 = vpop.permute.xlu1 %355  ;;  %v360_v57 = vpop.permute.xlu0 %359  ;;  %v636_v50 = vmov 64  }
  0xa3   :  { %v366_v58 = vadd.f32 %v365_v48, %v356_v56  ;;  %v367_v59 = vadd.f32 %v365_v48, %v360_v57  ;;  %537 = vset.pattern.permute.xlu1 %v636_v50  ;;  %538 = vset.pattern.permute.xlu0 %v636_v50 }
  0xa4   :  { %v271_v61 = vsel %vm692_vm2, %v269_v54, -9e+15  ;;  %v272_v62 = vsel %vm698_vm4, %v270_v55, -9e+15 }
  0xa5   :  { %v368_v63 = vmul.f32 0.01, %v366_v58  ;;  %v369_v0 = vmul.f32 0.01, %v367_v59  ;;  %176 = vmax.xlane.f32.xlu0 %v175_v60  ;;  %v273_v1 = vsel %vm70_vm3, %v271_v61, -inf  ;;  %v276_v2 = vsel %vm70_vm3, %v272_v62, -inf }
  0xa6   :  { %274 = vmax.xlane.f32.xlu1 %v273_v1 }
  0xa7   :  { %v370_v3 = vmax.f32 %v366_v58, %v368_v63  ;;  %v371_v4 = vmax.f32 %v367_v59, %v369_v0 }
  0xa9   :  { %277 = vmax.xlane.f32.xlu0 %v276_v2  ;;  %v372_v5 = vsel %vm692_vm2, %v370_v3, -9e+15  ;;  %v373_v6 = vsel %vm698_vm4, %v371_v4, -9e+15 }
  0xaa   :  { %v374_v7 = vsel %vm70_vm3, %v372_v5, -inf  ;;  %v377_v8 = vsel %vm70_vm3, %v373_v6, -inf }
  0xab   :  { %375 = vmax.xlane.f32.xlu1 %v374_v7 }
  0xad   :  { %378 = vmax.xlane.f32.xlu0 %v377_v8 }
 0x12a   :  { %v73_v12 = vpop.xlane.xlu1 %72 }
 0x12b   :  { %v77_v13 = vsub.f32 %v68_v37, %v73_v12 }
 0x12d   :  { %v79_v16 = vmul.f32 1.442695, %v77_v13 }
 0x12e   :  { %v174_v14 = vpop.xlane.xlu1 %173  ;;  %v76_v15 = vpop.xlane.xlu0 %75 }
 0x12f   :  { %v178_v17 = vsub.f32 %v170_v44, %v174_v14  ;;  %v78_v18 = vsub.f32 %v69_v47, %v76_v15  ;;  %543 = vpow2.f32 %v79_v16 }
 0x131   :  { %v81_v19 = vmul.f32 1.442695, %v78_v18  ;;  %v180_v20 = vmul.f32 1.442695, %v178_v17 }
 0x132   :  { %v177_v21 = vpop.xlane.xlu0 %176 }
 0x133   :  { %v179_v22 = vsub.f32 %v171_v53, %v177_v21  ;;  %v275_v23 = vpop.xlane.xlu1 %274  ;;  %545 = vpow2.f32 %v81_v19 }
 0x134   :  { %v279_v24 = vsub.f32 %v271_v61, %v275_v23  ;;  %547 = vpow2.f32 %v180_v20 }
 0x135   :  { %v182_v25 = vmul.f32 1.442695, %v179_v22 }
 0x136   :  { %v281_v26 = vmul.f32 1.442695, %v279_v24  ;;  %v278_v27 = vpop.xlane.xlu0 %277 }
 0x137   :  { %549 = vpow2.f32 %v182_v25  ;;  %v280_v28 = vsub.f32 %v272_v62, %v278_v27 }
 0x138   :  { %v376_v29 = vpop.xlane.xlu1 %375  ;;  %551 = vpow2.f32 %v281_v26 }
 0x139   :  { %v283_v30 = vmul.f32 1.442695, %v280_v28  ;;  %v380_v31 = vsub.f32 %v372_v5, %v376_v29  ;;  %v544_v35 = vpop.eup %543 }
 0x13a   :  { %v379_v32 = vpop.xlane.xlu0 %378 }
 0x13b   :  { %553 = vpow2.f32 %v283_v30  ;;  %v382_v33 = vmul.f32 1.442695, %v380_v31  ;;  %v381_v34 = vsub.f32 %v373_v6, %v379_v32 }
 0x13d   :  { %v384_v36 = vmul.f32 1.442695, %v381_v34  ;;  %v546_v37 = vpop.eup %545  ;;  %555 = vpow2.f32 %v382_v33 }
 0x13e   :  { %v83_v39 = vpack.c.bf16 %v546_v37, %v544_v35  ;;  %v548_v40 = vpop.eup %547 }
 0x13f   :  { %557 = vpow2.f32 %v384_v36 }
 0x140   :  { %497 = vmatmul.mubr.msk.bf16.vlgmr.msra.gmra.mrb[0].mxu0 %vm70_vm3, %v83_v39 }
 0x141   :  { %v550_v41 = vpop.eup %549  ;;  %507 = vmatpush3.bf16.msra.mxu0 %v541_v38  ;;  %508 = vmatprep.mubr.msk.bf16.mxu0 %vm635_vm5, %v634_v10 }
 0x142   :  { %v184_v43 = vpack.c.bf16 %v550_v41, %v548_v40  ;;  %v552_v44 = vpop.eup %551 }
 0x144   :  { %503 = vmatmul.mubr.msk.bf16.vlgmr.msra.gmra.mrb[0].mxu1 %vm70_vm3, %v184_v43 }
 0x145   :  { %v554_v45 = vpop.eup %553  ;;  %513 = vmatpush3.bf16.msra.mxu1 %v542_v42  ;;  %514 = vmatprep.mubr.msk.bf16.mxu1 %vm635_vm5, %v634_v10 }
 0x146   :  { %v285_v46 = vpack.c.bf16 %v554_v45, %v552_v44 }
 0x147   :  { %v556_v47 = vpop.eup %555 }
 0x148   :  { %509 = vmatmul.mubr.msk.bf16.vlgmr.msra.gmra.mrb[4].mxu0 %vm70_vm3, %v285_v46 }
 0x149   :  { %v558_v48 = vpop.eup %557 }
 0x14a   :  { %v386_v49 = vpack.c.bf16 %v558_v48, %v556_v47 }
 0x14c   :  { %515 = vmatmul.mubr.msk.bf16.vlgmr.msra.gmra.mrb[4].mxu1 %vm70_vm3, %v386_v49 }
 0x213   :  { %v129_v51 = vpop.f32.mrb[0].mxu0 }
 0x214   :  { %559 = vrcp.f32 %v129_v51  ;;  %v498_v52 = vpop.f32.mrb[1].mxu0 }
 0x215   :  { %v132_v53 = vpop.f32.mrb[2].mxu0 }
 0x216   :  { %561 = vrcp.f32 %v132_v53  ;;  %v499_v54 = vpop.f32.mrb[3].mxu0 }
 0x217   :  { %v230_v55 = vpop.f32.mrb[0].mxu1 }
 0x218   :  { %563 = vrcp.f32 %v230_v55  ;;  %v504_v56 = vpop.f32.mrb[1].mxu1 }
 0x219   :  { %v233_v57 = vpop.f32.mrb[2].mxu1 }
 0x21a   :  { %v505_v58 = vpop.f32.mrb[3].mxu1  ;;  %565 = vrcp.f32 %v233_v57 }
 0x21b   :  { %v331_v59 = vpop.f32.mrb[4].mxu0 }
 0x21c   :  { %v510_v60 = vpop.f32.mrb[5].mxu0  ;;  %567 = vrcp.f32 %v331_v59 }
 0x21d   :  { %v334_v61 = vpop.f32.mrb[6].mxu0 }
 0x21e   :  { %v560_v62 = vpop.eup %559  ;;  %v511_v63 = vpop.f32.mrb[7].mxu0 }
 0x21f   :  { %v432_v0 = vpop.f32.mrb[4].mxu1  ;;  %140 = vperm.xlu1 %537, %v560_v62  }
 0x220   :  { %v516_v1 = vpop.f32.mrb[5].mxu1  ;;  %v562_v2 = vpop.eup %561  ;;  %569 = vrcp.f32 %v432_v0 }
 0x221   :  { %v435_v3 = vpop.f32.mrb[6].mxu1  ;;  %145 = vperm.xlu0 %538, %v562_v2   ;;  %571 = vrcp.f32 %v334_v61 }
 0x222   :  { %v564_v4 = vpop.eup %563  ;;  %v517_v5 = vpop.f32.mrb[7].mxu1  ;;  %573 = vrcp.f32 %v435_v3 }
 0x223   :  { %241 = vperm.xlu1 %537, %v564_v4  }
 0x224   :  { %v566_v6 = vpop.eup %565 }
 0x226   :  { %v568_v7 = vpop.eup %567 }
 0x227   :  { %246 = vperm.xlu1 %537, %v566_v6  }
 0x22a   :  { %v570_v8 = vpop.eup %569 }
 0x22b   :  { %342 = vperm.xlu1 %537, %v568_v7   ;;  %v572_v9 = vpop.eup %571 }
 0x22c   :  { %v574_v10 = vpop.eup %573 }
 0x22f   :  { %443 = vperm.xlu1 %537, %v570_v8  }
 0x233   :  { %347 = vperm.xlu1 %537, %v572_v9  }
 0x237   :  { %448 = vperm.xlu1 %537, %v574_v10  }
 0x29e   :  { %v141_v11 = vpop.permute.xlu1 %140 }
 0x29f   :  { %v148_v13 = vmul.f32 %v141_v11, %v129_v51 }
 0x2a0   :  { %v146_v15 = vpop.permute.xlu0 %145 }
 0x2a1   :  { %v149_v18 = vmul.f32 %v146_v15, %v132_v53 }
 0x2a2   :  { %v242_v12 = vpop.permute.xlu1 %241 }
 0x2a3   :  { %v249_v14 = vmul.f32 %v242_v12, %v230_v55 }
 0x2a5   :  { %v251_v16 = vadd.f32 %v249_v14, %v148_v13 }
 0x2a6   :  { %v247_v17 = vpop.permute.xlu1 %246 }
 0x2a7   :  { %v250_v19 = vmul.f32 %v247_v17, %v233_v57 }
 0x2a9   :  { %v252_v20 = vadd.f32 %v250_v19, %v149_v18 }
 0x2aa   :  { %v343_v21 = vpop.permute.xlu1 %342 }
 0x2ab   :  { %v350_v22 = vmul.f32 %v343_v21, %v331_v59 }
 0x2ad   :  { %v352_v23 = vadd.f32 %v350_v22, %v251_v16 }
 0x2ae   :  { %v444_v24 = vpop.permute.xlu1 %443 }
 0x2af   :  { %v451_v25 = vmul.f32 %v444_v24, %v432_v0 }
 0x2b1   :  { %v453_v26 = vadd.f32 %v451_v25, %v352_v23 }
 0x2b2   :  { %v348_v27 = vpop.permute.xlu1 %347 }
 0x2b3   :  { %v455_v28 = vmul.f32 0.25, %v453_v26  ;;  %v351_v29 = vmul.f32 %v348_v27, %v334_v61 }
 0x2b5   :  { %575 = vtanh.f32 %v455_v28  ;;  %v353_v30 = vadd.f32 %v351_v29, %v252_v20 }
 0x2b6   :  { %v449_v31 = vpop.permute.xlu1 %448 }
 0x2b7   :  { %v452_v32 = vmul.f32 %v449_v31, %v435_v3 }
 0x2b9   :  { %v454_v33 = vadd.f32 %v452_v32, %v353_v30 }
 0x2bb   :  { %v456_v34 = vmul.f32 0.25, %v454_v33 }
 0x2bd   :  { %577 = vtanh.f32 %v456_v34 }
 0x2bf   :  { %v576_v35 = vpop.eup %575 }
 0x2c0   :  { %459 = vst [vmem:[#allocation5] sm:$0xff] %v576_v35 }
 0x2c7   :  { %v578_v36 = vpop.eup %577 }
 0x2c8   :  { %460 = vst [vmem:[#allocation5 + $0x8] sm:$0xff] %v578_v36 }
 0x2c9   :  { %612 = shalt.err (!%p609_p12)
}
 0x2ca   :  { %s613_s14 = scalar_lea.hbm %s748_s4, 256 }
 0x2cb   :  { %p614_p13 = scmp.ne.s32.totalorder %s748_s4, %s613_s14  ;;  %p617_p0 = scmp.lt.u32.totalorder %s613_s14, %s748_s4 }
 0x2cd   :  { %p619_p1 = pnand %p617_p0, %p614_p13 }
 0x2cf   :  { %622 = shalt.err (!%p619_p1)
}
 0x2d0   :  { %s638_s19 = smov 128   ;;  %s639_s20 = smov 8  }
 0x2d1   :  { %472 = dma.vmem_to_hbm [thread:$0]  %s467_s2, 256, %s748_s4, [#allocation4], %s638_s19, %s638_s19, %s639_s20  }
 0x2d2   :  { %625 = dma.done.wait [#allocation4], 256  }
 0x2d3   :  { %626 = vsyncadd [#allocation4], 4294967040 }
 0x2d4   :  { %476 = vsyncpa [#allocation3], 1 }
 0x2d5   :  { %477 = vsyncpa [#allocation4], 1 }

</bundles_post_ra>
